<compile_context>
chip_gen: v7x
topology: tpu7x:2x2x1
jax: 0.10.0
libtpu: 0.0.40
codegen_flags: <defaults>
</compile_context>

<pallas_src>
from functools import partial

import jax
import jax.numpy as jnp
from jax.experimental import pallas as pl
from jax.experimental.pallas import tpu as pltpu


def _round_up(x, m):
    return (x + m - 1) // m * m


def sage_layer_kernel(a_ref, xk_ref, xi_ref, invd_ref, wl_ref, wr_ref, b_ref,
                      o_ref, acc_ref, *, apply_relu, apply_norm):
    """One fused SAGEConv layer, tiled over (row-tile i, reduction-tile k).

    a_ref   : (TM, TK)            0/1 adjacency mask tile (int8)
    xk_ref  : (TK, Cin_pad)       node features, reduction slice (bf16)
    xi_ref  : (TM, Cin_pad)       node features, self/root slice  (bf16)
    invd_ref: (TM, 1)             exact f32 1/deg per row
    wl_ref  : (Cin_pad, Cout_pad) W_l (bf16)
    wr_ref  : (Cin_pad, Cout_pad) W_r (bf16)
    b_ref   : (1, Cout_pad)       bias of lin_l (f32)
    o_ref   : (TM, Cout_pad)      output tile (bf16 hidden / f32 last)
    acc_ref : (TM, Cin_pad)       f32 VMEM accumulator (sum aggregation)
    """
    k = pl.program_id(1)

    @pl.when(k == 0)
    def _():
        acc_ref[...] = jnp.zeros_like(acc_ref)

    # streaming neighbor sum: acc += A_mask[i, k] @ X[k]   (MXU, bf16 -> f32)
    a = a_ref[...].astype(jnp.bfloat16)
    acc_ref[...] += jnp.dot(a, xk_ref[...], preferred_element_type=jnp.float32)

    @pl.when(k == pl.num_programs(1) - 1)
    def _():
        # mean aggregation: exact f32 1/deg applied once, then bf16 for the MXU
        agg = (acc_ref[...] * invd_ref[...]).astype(jnp.bfloat16)
        x_self = xi_ref[...]
        # fused lin_l / lin_r, no concat: two MXU pushes sharing the f32 sum
        out = (jnp.dot(agg, wl_ref[...], preferred_element_type=jnp.float32)
               + jnp.dot(x_self, wr_ref[...], preferred_element_type=jnp.float32)
               + b_ref[...])
        if apply_relu:
            out = jnp.maximum(out, 0.0)
            # NOTE: F.dropout with training=False is the identity.
        if apply_norm:
            # F.normalize(p=2, dim=-1): x / max(||x||_2, 1e-12)
            ss = jnp.sum(out * out, axis=-1, keepdims=True)
            out = out * jax.lax.rsqrt(jnp.maximum(ss, 1e-24))   # EUP rsqrt
        o_ref[...] = out.astype(o_ref.dtype)


def sage_layer(a_i8, x_bf16, inv_deg, w_l, w_r, b, *, apply_relu, apply_norm,
               tm, tk, out_dtype):
    """One SAGEConv layer over padded inputs. Returns (N_pad, Cout_pad)."""
    n_pad = a_i8.shape[0]
    cin_pad = x_bf16.shape[1]
    cout_pad = w_l.shape[1]
    grid = (n_pad // tm, n_pad // tk)

    kernel = partial(sage_layer_kernel,
                     apply_relu=apply_relu, apply_norm=apply_norm)

    out_bytes = jnp.dtype(out_dtype).itemsize
    flops = 2 * n_pad * n_pad * cin_pad + 4 * n_pad * cin_pad * cout_pad
    bytes_accessed = (a_i8.size                                  # A mask (int8)
                      + grid[0] * n_pad * cin_pad * 2            # Xk re-read / row tile
                      + n_pad * cin_pad * 2                      # Xi (self)
                      + n_pad * 4                                # 1/deg
                      + (w_l.size + w_r.size) * 2 + b.size * 4   # weights / bias
                      + n_pad * cout_pad * out_bytes)            # output
    transcendentals = n_pad if apply_norm else 0

    # VMEM residency estimate (double-buffered pipelined blocks + f32 acc)
    resident = (2 * tm * tk * 1
                + 2 * tk * cin_pad * 2
                + 2 * tm * cin_pad * 2
                + 2 * tm * 4
                + 2 * 2 * cin_pad * cout_pad * 2
                + 2 * cout_pad * 4
                + 2 * tm * cout_pad * out_bytes
                + tm * cin_pad * 4)
    vmem_limit = int(min(96 * 1024 * 1024,
                         max(32 * 1024 * 1024, 2 * resident)))

    return pl.pallas_call(
        kernel,
        out_shape=jax.ShapeDtypeStruct((n_pad, cout_pad), out_dtype),
        grid_spec=pltpu.PrefetchScalarGridSpec(
            num_scalar_prefetch=0,
            grid=grid,
            in_specs=[
                pl.BlockSpec((tm, tk), lambda i, k: (i, k)),             # A mask
                pl.BlockSpec((tk, cin_pad), lambda i, k: (k, 0)),        # X (reduction)
                pl.BlockSpec((tm, cin_pad), lambda i, k: (i, 0)),        # X (self)
                pl.BlockSpec((tm, 1), lambda i, k: (i, 0)),              # 1/deg
                pl.BlockSpec((cin_pad, cout_pad), lambda i, k: (0, 0)),  # W_l
                pl.BlockSpec((cin_pad, cout_pad), lambda i, k: (0, 0)),  # W_r
                pl.BlockSpec((1, cout_pad), lambda i, k: (0, 0)),        # bias
            ],
            out_specs=pl.BlockSpec((tm, cout_pad), lambda i, k: (i, 0)),
            scratch_shapes=[pltpu.VMEM((tm, cin_pad), jnp.float32)],
        ),
        compiler_params=pltpu.CompilerParams(
            dimension_semantics=("parallel", "arbitrary"),
            vmem_limit_bytes=vmem_limit,
        ),
        cost_estimate=pl.CostEstimate(flops=int(flops),
                                      transcendentals=int(transcendentals),
                                      bytes_accessed=int(bytes_accessed)),
    )(a_i8, x_bf16, x_bf16, inv_deg, w_l, w_r, b)


def init_sage_params(key, in_channels, hidden_channels, out_channels,
                     num_layers):
    """Deterministic Glorot-ish init matching SAGEConv parameter shapes."""
    if num_layers == 1:
        dims = [(in_channels, out_channels)]
    else:
        dims = [(in_channels, hidden_channels)]
        dims += [(hidden_channels, hidden_channels)] * (num_layers - 2)
        dims += [(hidden_channels, out_channels)]

    params = []
    for (cin, cout) in dims:
        key, k1, k2 = jax.random.split(key, 3)
        scale = 1.0 / jnp.sqrt(jnp.float32(cin))
        w_l = jax.random.uniform(k1, (cin, cout), jnp.float32, -scale, scale)
        w_r = jax.random.uniform(k2, (cin, cout), jnp.float32, -scale, scale)
        b = jnp.zeros((1, cout), jnp.float32)
        params.append((w_l, w_r, b))
    return params


def sage_forward(x, adj, params, norm_emb):
    """adj: dense 0/1 adjacency (N, N); mean aggr == (adj @ x) / max(deg, 1)."""
    n, cin = x.shape
    n_pad = _round_up(n, 128)

    # reduction tile: largest of (512, 256, 128) dividing the padded node count
    tk = 128
    for t in (512, 256, 128):
        if n_pad % t == 0:
            tk = t
            break
    # row tile: shrink so grid[0] >= 2 when possible (keeps both v7x TCs busy)
    tm = tk
    while tm > 128 and n_pad // tm < 2:
        tm //= 2

    # adjacency as an int8 0/1 mask; cast BEFORE padding so no f32 N^2 temp
    mask = (adj > 0).astype(jnp.int8)
    a_i8 = jnp.zeros((n_pad, n_pad), jnp.int8).at[:n, :n].set(mask)

    # exact f32 degree normalization (isolated nodes aggregate to 0)
    deg = jnp.sum(adj.astype(jnp.float32), axis=1)
    inv_deg = 1.0 / jnp.maximum(deg, 1.0)
    inv_pad = jnp.zeros((n_pad, 1), jnp.float32).at[:n, 0].set(inv_deg)

    cin_pad = _round_up(cin, 128)
    h = jnp.zeros((n_pad, cin_pad), jnp.bfloat16).at[:n, :cin].set(
        x.astype(jnp.bfloat16))

    n_layers = len(params)
    out = None
    for li, (w_l, w_r, b) in enumerate(params):
        c_in, c_out = w_l.shape
        cin_p = _round_up(c_in, 128)
        cout_p = _round_up(c_out, 128)
        # zero-padded, lane-dense bf16 weights; f32 bias
        wl_pad = jnp.zeros((cin_p, cout_p), jnp.bfloat16).at[:c_in, :c_out].set(
            w_l.astype(jnp.bfloat16))
        wr_pad = jnp.zeros((cin_p, cout_p), jnp.bfloat16).at[:c_in, :c_out].set(
            w_r.astype(jnp.bfloat16))
        b_pad = jnp.zeros((1, cout_p), jnp.float32).at[:, :c_out].set(b)

        last = li == n_layers - 1
        out = sage_layer(a_i8, h, inv_pad, wl_pad, wr_pad, b_pad,
                         apply_relu=not last,
                         apply_norm=(last and norm_emb),
                         tm=tm, tk=tk,
                         out_dtype=jnp.float32 if last else jnp.bfloat16)
        if not last:
            h = out   # already bf16 straight from the kernel (no extra cast pass)

    c_out_final = params[-1][0].shape[1]
    return out[:n, :c_out_final]


if __name__ == "__main__":
    key = jax.random.PRNGKey(0)

    # small shapes: 16 nodes, in=8, hidden=32, out=16, 2 layers
    N, IN_C, HID_C, OUT_C, NUM_LAYERS = 16, 8, 32, 16, 2
    config = {"norm_emb": True}

    key, kx, ka = jax.random.split(key, 3)
    x = jax.random.normal(kx, (N, IN_C), jnp.float32)

    # random symmetric 0/1 adjacency (no self loops)
    adj = (jax.random.uniform(ka, (N, N)) < 0.3).astype(jnp.float32)
    adj = jnp.maximum(adj, adj.T) * (1.0 - jnp.eye(N, dtype=jnp.float32))

    params = init_sage_params(key, IN_C, HID_C, OUT_C, NUM_LAYERS)

    out = sage_forward(x, adj, params, config["norm_emb"])
    out = jax.block_until_ready(out)

    assert out.shape == (N, OUT_C)
    assert bool(jnp.all(jnp.isfinite(out)))
    print("KERNEL_OK")
</pallas_src>

<mosaic_0001>
module attributes {stable_mosaic.version = 11 : i64} {
  func.func @sage_layer_kernel(%arg0: i32, %arg1: i32, %arg2: memref<128x128xi8, #tpu.memory_space<vmem>>, %arg3: memref<128x128xbf16, #tpu.memory_space<vmem>>, %arg4: memref<128x128xbf16, #tpu.memory_space<vmem>>, %arg5: memref<128x1xf32, #tpu.memory_space<vmem>>, %arg6: memref<128x128xbf16, #tpu.memory_space<vmem>>, %arg7: memref<128x128xbf16, #tpu.memory_space<vmem>>, %arg8: memref<1x128xf32, #tpu.memory_space<vmem>>, %arg9: memref<128x128xbf16, #tpu.memory_space<vmem>>, %arg10: memref<128x128xf32, #tpu.memory_space<vmem>>) attributes {dimension_semantics = [#tpu.dimension_semantics<parallel>, #tpu.dimension_semantics<arbitrary>], iteration_bounds = array<i64: 1, 1>, scalar_prefetch = 0 : i64, scratch_operands = 1 : i64, tpu.core_type = #tpu.core_type<tc>, window_params = [{transform_indices = @transform_0, window_bounds = array<i64: 128, 128>}, {transform_indices = @transform_1, window_bounds = array<i64: 128, 128>}, {transform_indices = @transform_2, window_bounds = array<i64: 128, 128>}, {transform_indices = @transform_3, window_bounds = array<i64: 128, 1>}, {pipeline_mode = #tpu.pipeline_mode<synchronous>, transform_indices = @transform_4, window_bounds = array<i64: 128, 128>}, {pipeline_mode = #tpu.pipeline_mode<synchronous>, transform_indices = @transform_5, window_bounds = array<i64: 128, 128>}, {pipeline_mode = #tpu.pipeline_mode<synchronous>, transform_indices = @transform_6, window_bounds = array<i64: 1, 128>}, {transform_indices = @transform_7, window_bounds = array<i64: 128, 128>}]} {
    %c0_i32 = arith.constant 0 : i32
    %0 = arith.cmpi eq, %arg1, %c0_i32 : i32
    %1 = arith.extui %0 : i1 to i32
    %c0_i32_0 = arith.constant 0 : i32
    %2 = arith.cmpi ne, %1, %c0_i32_0 : i32
    scf.if %2 {
      %cst_10 = arith.constant 0.000000e+00 : f32
      %13 = vector.broadcast %cst_10 : f32 to vector<128x128xf32>
      %c0_11 = arith.constant 0 : index
      %c0_12 = arith.constant 0 : index
      %14 = vector.load %arg10[%c0_11, %c0_12] : memref<128x128xf32, #tpu.memory_space<vmem>>, vector<128x128xf32>
      tpu.vector_store %arg10[%c0_11, %c0_12], %13 {strides = array<i32>} : memref<128x128xf32, #tpu.memory_space<vmem>>, vector<128x128xf32>,
    } else {
    }
    %c0 = arith.constant 0 : index
    %c0_1 = arith.constant 0 : index
    %3 = vector.load %arg2[%c0, %c0_1] : memref<128x128xi8, #tpu.memory_space<vmem>>, vector<128x128xi8>
    %4 = arith.sitofp %3 : vector<128x128xi8> to vector<128x128xbf16>
    %c0_2 = arith.constant 0 : index
    %c0_3 = arith.constant 0 : index
    %5 = vector.load %arg10[%c0_2, %c0_3] : memref<128x128xf32, #tpu.memory_space<vmem>>, vector<128x128xf32>
    %c0_4 = arith.constant 0 : index
    %c0_5 = arith.constant 0 : index
    %6 = vector.load %arg3[%c0_4, %c0_5] : memref<128x128xbf16, #tpu.memory_space<vmem>>, vector<128x128xbf16>
    %cst = arith.constant dense<0.000000e+00> : vector<128x128xf32>
    %7 = tpu.matmul %4, %6, %cst {dimension_numbers = #tpu.dot_dimension_numbers<[1], [0], [0], [1], [0, 0, 1, 1], [], []>} : vector<128x128xbf16>, vector<128x128xbf16>, vector<128x128xf32> -> vector<128x128xf32>
    %8 = arith.addf %5, %7 : vector<128x128xf32>
    %c0_6 = arith.constant 0 : index
    %c0_7 = arith.constant 0 : index
    %9 = vector.load %arg10[%c0_6, %c0_7] : memref<128x128xf32, #tpu.memory_space<vmem>>, vector<128x128xf32>
    tpu.vector_store %arg10[%c0_6, %c0_7], %8 {strides = array<i32>} : memref<128x128xf32, #tpu.memory_space<vmem>>, vector<128x128xf32>,
    %c0_i32_8 = arith.constant 0 : i32
    %10 = arith.cmpi eq, %arg1, %c0_i32_8 : i32
    %11 = arith.extui %10 : i1 to i32
    %c0_i32_9 = arith.constant 0 : i32
    %12 = arith.cmpi ne, %11, %c0_i32_9 : i32
    scf.if %12 {
      %c0_10 = arith.constant 0 : index
      %c0_11 = arith.constant 0 : index
      %13 = vector.load %arg10[%c0_10, %c0_11] : memref<128x128xf32, #tpu.memory_space<vmem>>, vector<128x128xf32>
      %c0_12 = arith.constant 0 : index
      %c0_13 = arith.constant 0 : index
      %14 = vector.load %arg5[%c0_12, %c0_13] : memref<128x1xf32, #tpu.memory_space<vmem>>, vector<128x1xf32>
      %15 = vector.broadcast %14 : vector<128x1xf32> to vector<128x128xf32>
      %16 = arith.mulf %13, %15 : vector<128x128xf32>
      %17 = arith.truncf %16 : vector<128x128xf32> to vector<128x128xbf16>
      %c0_14 = arith.constant 0 : index
      %c0_15 = arith.constant 0 : index
      %18 = vector.load %arg4[%c0_14, %c0_15] : memref<128x128xbf16, #tpu.memory_space<vmem>>, vector<128x128xbf16>
      %c0_16 = arith.constant 0 : index
      %c0_17 = arith.constant 0 : index
      %19 = vector.load %arg6[%c0_16, %c0_17] : memref<128x128xbf16, #tpu.memory_space<vmem>>, vector<128x128xbf16>
      %cst_18 = arith.constant dense<0.000000e+00> : vector<128x128xf32>
      %20 = tpu.matmul %17, %19, %cst_18 {dimension_numbers = #tpu.dot_dimension_numbers<[1], [0], [0], [1], [0, 0, 1, 1], [], []>} : vector<128x128xbf16>, vector<128x128xbf16>, vector<128x128xf32> -> vector<128x128xf32>
      %c0_19 = arith.constant 0 : index
      %c0_20 = arith.constant 0 : index
      %21 = vector.load %arg7[%c0_19, %c0_20] : memref<128x128xbf16, #tpu.memory_space<vmem>>, vector<128x128xbf16>
      %cst_21 = arith.constant dense<0.000000e+00> : vector<128x128xf32>
      %22 = tpu.matmul %18, %21, %cst_21 {dimension_numbers = #tpu.dot_dimension_numbers<[1], [0], [0], [1], [0, 0, 1, 1], [], []>} : vector<128x128xbf16>, vector<128x128xbf16>, vector<128x128xf32> -> vector<128x128xf32>
      %23 = arith.addf %20, %22 : vector<128x128xf32>
      %c0_22 = arith.constant 0 : index
      %c0_23 = arith.constant 0 : index
      %24 = vector.load %arg8[%c0_22, %c0_23] : memref<1x128xf32, #tpu.memory_space<vmem>>, vector<1x128xf32>
      %25 = vector.broadcast %24 : vector<1x128xf32> to vector<128x128xf32>
      %26 = arith.addf %23, %25 : vector<128x128xf32>
      %cst_24 = arith.constant 0.000000e+00 : f32
      %27 = vector.broadcast %cst_24 : f32 to vector<128x128xf32>
      %28 = arith.maximumf %26, %27 : vector<128x128xf32>
      %29 = arith.truncf %28 : vector<128x128xf32> to vector<128x128xbf16>
      %c0_25 = arith.constant 0 : index
      %c0_26 = arith.constant 0 : index
      %30 = vector.load %arg9[%c0_25, %c0_26] : memref<128x128xbf16, #tpu.memory_space<vmem>>, vector<128x128xbf16>
      tpu.vector_store %arg9[%c0_25, %c0_26], %29 {strides = array<i32>} : memref<128x128xbf16, #tpu.memory_space<vmem>>, vector<128x128xbf16>,
    } else {
    }
    return
  }
  func.func @transform_0(%arg0: i32, %arg1: i32) -> (i32, i32) {
    %c0_i32 = arith.constant 0 : i32
    return %arg0, %arg1 : i32, i32
  }
  func.func @transform_1(%arg0: i32, %arg1: i32) -> (i32, i32) {
    %c0_i32 = arith.constant 0 : i32
    %c0_i32_0 = arith.constant 0 : i32
    return %arg1, %c0_i32 : i32, i32
  }
  func.func @transform_2(%arg0: i32, %arg1: i32) -> (i32, i32) {
    %c0_i32 = arith.constant 0 : i32
    %c0_i32_0 = arith.constant 0 : i32
    return %arg0, %c0_i32 : i32, i32
  }
  func.func @transform_3(%arg0: i32, %arg1: i32) -> (i32, i32) {
    %c0_i32 = arith.constant 0 : i32
    %c0_i32_0 = arith.constant 0 : i32
    return %arg0, %c0_i32 : i32, i32
  }
  func.func @transform_4(%arg0: i32, %arg1: i32) -> (i32, i32) {
    %c0_i32 = arith.constant 0 : i32
    %c0_i32_0 = arith.constant 0 : i32
    %c0_i32_1 = arith.constant 0 : i32
    return %c0_i32, %c0_i32_0 : i32, i32
  }
  func.func @transform_5(%arg0: i32, %arg1: i32) -> (i32, i32) {
    %c0_i32 = arith.constant 0 : i32
    %c0_i32_0 = arith.constant 0 : i32
    %c0_i32_1 = arith.constant 0 : i32
    return %c0_i32, %c0_i32_0 : i32, i32
  }
  func.func @transform_6(%arg0: i32, %arg1: i32) -> (i32, i32) {
    %c0_i32 = arith.constant 0 : i32
    %c0_i32_0 = arith.constant 0 : i32
    %c0_i32_1 = arith.constant 0 : i32
    return %c0_i32, %c0_i32_0 : i32, i32
  }
  func.func @transform_7(%arg0: i32, %arg1: i32) -> (i32, i32) {
    %c0_i32 = arith.constant 0 : i32
    %c0_i32_0 = arith.constant 0 : i32
    return %arg0, %c0_i32 : i32, i32
  }
}

</mosaic_0001>

<bundles_post_ra>
// kernel: tpu_custom_call.1
= control target key start
LH: loop header
LB: loop body
LE: loop exit
PB: predicated region body
PF: predicated region fallthrough
CT: control target
= control target key end

     0   :  { %12 = vsyncpa [#allocation4], 0  ;;  %s1624_s0 = inlined_call_operand.hbm [shape: s8[128,128], index: 0, kind: input, shape index: {}]   ;;  %s1625_s1 = inlined_call_operand.vmem [shape: bf16[128,128], index: 1, kind: input, shape index: {}]   ;;  %s1626_s2 = inlined_call_operand.vmem [shape: bf16[128,128], index: 2, kind: input, shape index: {}]   ;;  %s1627_s3 = inlined_call_operand.vmem [shape: f32[128,1], index: 3, kind: input, shape index: {}]   ;;  %s1628_s4 = inlined_call_operand.hbm [shape: bf16[128,128], index: 4, kind: input, shape index: {}]   ;;  %s1629_s5 = inlined_call_operand.hbm [shape: bf16[128,128], index: 5, kind: input, shape index: {}]   ;;  %s1630_s6 = inlined_call_operand.vmem [shape: f32[1,128], index: 6, kind: input, shape index: {}]   ;;  %s1631_s7 = inlined_call_operand.hbm [shape: bf16[128,128], index: 7, kind: output, shape index: {}]  }
   0x1   :  { %13 = vsyncpa [#allocation7], 0 }
   0x2   :  { %14 = vsyncpa [#allocation5], 0  ;;  %s1397_s24 = smov [#allocation6]   ;;  %s1303_s28 = scalar_lea.hbm %s1628_s4, 1024 }
   0x3   :  { %s38_s25 = sshll.u32 %s1397_s24, 4  ;;  %p1304_p0 = scmp.ne.s32.totalorder %s1628_s4, %s1303_s28  ;;  %s39_s25 = int_to_ptr.vmem [resolvable:$true] %s38_s25 }
   0x4   :  { %p1307_p1 = scmp.lt.u32.totalorder %s1303_s28, %s1628_s4 }
   0x6   :  { %p1309_p2 = pnand %p1307_p1, %p1304_p0 }
   0x8   :  { %1312 = shalt.err (!%p1309_p2)
}
   0x9   :  { %s1313_s10 = scalar_lea.vmem %s39_s25, 1024  ;;  %p1318_p4 = scmp.lt.s32.totalorder %s39_s25, %s39_s25 }
   0xa   :  { %p1314_p3 = scmp.ne.s32.totalorder %s39_s25, %s1313_s10  ;;  %p1319_p5 = scmp.lt.s32.totalorder %s1313_s10, %s1313_s10 }
   0xc   :  { %p1320_p6 = por %p1319_p5, %p1318_p4 }
   0xe   :  { %p1321_p7 = pnand %p1320_p6, %p1314_p3 }
  0x10   :  { %1324 = shalt.err (!%p1321_p7)
}
  0x11   :  { %s1398_s11 = smov 64   ;;  %s1399_s12 = smov 4  }
  0x12   :  { %44 = dma.hbm_to_vmem [thread:$0]  %s1628_s4, 1024, %s39_s25, [#allocation7], %s1398_s11, %s1398_s11, %s1399_s12  }
  0x13   :  { %s1400_s15 = smov [#allocation3]   ;;  %s1325_s19 = scalar_lea.hbm %s1624_s0, 512 }
  0x14   :  { %s20_s16 = sshll.u32 %s1400_s15, 4  ;;  %p1326_p8 = scmp.ne.s32.totalorder %s1624_s0, %s1325_s19  ;;  %s21_s16 = int_to_ptr.vmem [resolvable:$true] %s20_s16 }
  0x15   :  { %p1329_p9 = scmp.lt.u32.totalorder %s1325_s19, %s1624_s0 }
  0x17   :  { %p1331_p10 = pnand %p1329_p9, %p1326_p8 }
  0x19   :  { %1334 = shalt.err (!%p1331_p10)
}
  0x1a   :  { %s1335_s24 = scalar_lea.vmem %s21_s16, 512  ;;  %p1340_p12 = scmp.lt.s32.totalorder %s21_s16, %s21_s16 }
  0x1b   :  { %p1336_p11 = scmp.ne.s32.totalorder %s21_s16, %s1335_s24  ;;  %p1341_p13 = scmp.lt.s32.totalorder %s1335_s24, %s1335_s24 }
  0x1d   :  { %p1342_p0 = por %p1341_p13, %p1340_p12 }
  0x1f   :  { %p1343_p1 = pnand %p1342_p0, %p1336_p11 }
  0x21   :  { %1346 = shalt.err (!%p1343_p1)
}
  0x22   :  { %s1401_s4 = smov 128   ;;  %s1402_s25 = smov 8  }
  0x23   :  { %26 = dma.hbm_to_vmem [thread:$0]  %s1624_s0, 512, %s21_s16, [#allocation4], %s1401_s4, %s1401_s4, %s1402_s25  }
  0x24   :  { %s1403_s28 = smov [#allocation8]   ;;  %s1347_s9 = scalar_lea.hbm %s1629_s5, 1024 }
  0x25   :  { %s50_s29 = sshll.u32 %s1403_s28, 4  ;;  %p1348_p2 = scmp.ne.s32.totalorder %s1629_s5, %s1347_s9  ;;  %s51_s29 = int_to_ptr.vmem [resolvable:$true] %s50_s29 }
  0x26   :  { %p1351_p3 = scmp.lt.u32.totalorder %s1347_s9, %s1629_s5 }
  0x28   :  { %p1353_p4 = pnand %p1351_p3, %p1348_p2 }
  0x2a   :  { %1356 = shalt.err (!%p1353_p4)
}
  0x2b   :  { %s1357_s17 = scalar_lea.vmem %s51_s29, 1024  ;;  %p1362_p6 = scmp.lt.s32.totalorder %s51_s29, %s51_s29 }
  0x2c   :  { %p1358_p5 = scmp.ne.s32.totalorder %s51_s29, %s1357_s17  ;;  %p1363_p7 = scmp.lt.s32.totalorder %s1357_s17, %s1357_s17 }
  0x2e   :  { %p1364_p8 = por %p1363_p7, %p1362_p6 }
  0x30   :  { %p1365_p9 = pnand %p1364_p8, %p1358_p5 }
  0x32   :  { %1368 = shalt.err (!%p1365_p9)
}
  0x33   :  { %56 = dma.hbm_to_vmem [thread:$0]  %s1629_s5, 1024, %s51_s29, [#allocation7], %s1398_s11, %s1398_s11, %s1399_s12  }
  0x34   :  { %1391 = dma.done.wait [#allocation4], 512  }
  0x35   :  { %1392 = vsyncadd [#allocation4], 4294966784 }
  0x36   :  { %1393 = dma.done.wait [#allocation7], 2048  }
  0x37   :  { %1394 = vsyncadd [#allocation7], 4294965248  ;;  %v1404_v0 = vmov 0   ;;  %v1271_v1 = vld [vmem:[%s1625_s1] sm:$0xff]   ;;  %v1272_v2 = vld [vmem:[%s1625_s1 + $0x8] sm:$0xff]  }
  0x38   :  { %1270 = vset.pattern.permute.xlu1 %v1404_v0  ;;  %1269 = vset.pattern.permute.xlu0 %v1404_v0  ;;  %v1273_v3 = vld [vmem:[%s1625_s1 + $0x10] sm:$0xff]   ;;  %v1274_v4 = vld [vmem:[%s1625_s1 + $0x18] sm:$0xff]   ;;  %v1500_v5 = vld [vmem:[#allocation3] sm:$0xff] }
  0x39   :  { %1132 = vmatprep.subr.bf16.mxu0 %v1271_v1  ;;  %v93_v6 = vunpack.c.l.s8.bf16 %v1500_v5  ;;  %v331_v7 = vld [vmem:[%s1627_s3 + $0x10] sm:$0xff]  ;;  %v329_v8 = vld [vmem:[%s1627_s3] sm:$0xff]  ;;  %v332_v9 = vld [vmem:[%s1627_s3 + $0x18] sm:$0xff]  ;;  %v94_v32 = vunpack.c.h.s8.bf16 %v1500_v5 }
  0x3a   :  { %1133 = vmatpush3.bf16.msra.mxu0 %v1271_v1  ;;  %357 = vperm.xlu1 %1270, %v331_v7   ;;  %v330_v10 = vld [vmem:[%s1627_s3 + $0x8] sm:$0xff]  ;;  %v1275_v11 = vld [vmem:[%s1625_s1 + $0x20] sm:$0xff]   ;;  %v1277_v17 = vld [vmem:[%s1625_s1 + $0x30] sm:$0xff]  }
  0x3b   :  { %1134 = vmatprep.subr.bf16.mxu0 %v1272_v2  ;;  %347 = vperm.xlu0 %1269, %v329_v8   ;;  %v1276_v12 = vld [vmem:[%s1625_s1 + $0x28] sm:$0xff]   ;;  %v337_v14 = vld [vmem:[%s1627_s3 + $0x40] sm:$0xff]  ;;  %v340_v18 = vld [vmem:[%s1627_s3 + $0x58] sm:$0xff] }
  0x3c   :  { %1148 = vmatprep.mubr.bf16.mxu0 %v93_v6  ;;  %v338_v13 = vld [vmem:[%s1627_s3 + $0x48] sm:$0xff]  ;;  %v1279_v15 = vld [vmem:[#allocation8] sm:$0xff]   ;;  %v339_v19 = vld [vmem:[%s1627_s3 + $0x50] sm:$0xff] }
  0x3d   :  { %v1280_v16 = vld [vmem:[#allocation8 + $0x8] sm:$0xff]   ;;  %1164 = vmatprep.subr.bf16.mxu1 %v1279_v15  ;;  %v1281_v20 = vld [vmem:[#allocation8 + $0x10] sm:$0xff]   ;;  %v1278_v21 = vld [vmem:[%s1625_s1 + $0x38] sm:$0xff]  }
  0x3e   :  { %1135 = vmatpush3.bf16.msra.mxu0 %v1272_v2  ;;  %362 = vperm.xlu1 %1270, %v332_v9   ;;  %v334_v22 = vld [vmem:[%s1627_s3 + $0x28] sm:$0xff]  ;;  %v333_v23 = vld [vmem:[%s1627_s3 + $0x20] sm:$0xff]  ;;  %v1282_v24 = vld [vmem:[#allocation8 + $0x18] sm:$0xff]  }
  0x3f   :  { %1136 = vmatprep.subr.bf16.mxu0 %v1273_v3  ;;  %352 = vperm.xlu0 %1269, %v330_v10   ;;  %v336_v25 = vld [vmem:[%s1627_s3 + $0x38] sm:$0xff]  ;;  %v335_v26 = vld [vmem:[%s1627_s3 + $0x30] sm:$0xff]  ;;  %v90_v27 = vld [vmem:[#allocation3 + $0x8] sm:$0xff] }
  0x40   :  { %1165 = vmatpush3.bf16.msra.mxu1 %v1279_v15  ;;  %v1290_v28 = vld [vmem:[%s1626_s2] sm:$0xff]   ;;  %v342_v31 = vld [vmem:[%s1627_s3 + $0x68] sm:$0xff]  ;;  %v95_v34 = vunpack.c.l.s8.bf16 %v90_v27  ;;  %v91_v37 = vld [vmem:[#allocation3 + $0x10] sm:$0xff]  ;;  %v96_v42 = vunpack.c.h.s8.bf16 %v90_v27 }
  0x41   :  { %1166 = vmatprep.subr.bf16.mxu1 %v1280_v16  ;;  %v1283_v29 = vld [vmem:[#allocation8 + $0x20] sm:$0xff]   ;;  %1180 = vmatprep.mubr.bf16.mxu1 %v1290_v28  ;;  %v1285_v35 = vld [vmem:[#allocation8 + $0x28] sm:$0xff]   ;;  %v344_v38 = vld [vmem:[%s1627_s3 + $0x78] sm:$0xff]  ;;  %v97_v43 = vunpack.c.l.s8.bf16 %v91_v37  ;;  %v98_v48 = vunpack.c.h.s8.bf16 %v91_v37 }
  0x42   :  { %1137 = vmatpush3.bf16.msra.mxu0 %v1273_v3  ;;  %392 = vperm.xlu1 %1270, %v338_v13   ;;  %v1284_v30 = vld [vmem:[#allocation6] sm:$0xff]   ;;  %v1286_v36 = vld [vmem:[#allocation6 + $0x8] sm:$0xff]   ;;  %v343_v39 = vld [vmem:[%s1627_s3 + $0x70] sm:$0xff] }
  0x43   :  { %1138 = vmatprep.subr.bf16.mxu0 %v1274_v4  ;;  %387 = vperm.xlu0 %1269, %v337_v14   ;;  %v341_v33 = vld [vmem:[%s1627_s3 + $0x60] sm:$0xff]  ;;  %v1287_v40 = vld [vmem:[#allocation8 + $0x30] sm:$0xff]   ;;  %v1289_v44 = vld [vmem:[#allocation8 + $0x38] sm:$0xff]  }
  0x44   :  { %1167 = vmatpush3.bf16.msra.mxu1 %v1280_v16  ;;  %v1288_v41 = vld [vmem:[#allocation6 + $0x10] sm:$0xff]   ;;  %v1291_v45 = vld [vmem:[#allocation6 + $0x18] sm:$0xff]   ;;  %v1293_v47 = vld [vmem:[#allocation6 + $0x20] sm:$0xff]  }
  0x45   :  { %1168 = vmatprep.subr.bf16.mxu1 %v1281_v20  ;;  %v92_v46 = vld [vmem:[#allocation3 + $0x18] sm:$0xff]  ;;  %v1292_v50 = vld [vmem:[%s1626_s2 + $0x8] sm:$0xff]   ;;  %v1294_v51 = vld [vmem:[%s1626_s2 + $0x10] sm:$0xff]  }
  0x46   :  { %1139 = vmatpush3.bf16.msra.mxu0 %v1274_v4  ;;  %402 = vperm.xlu1 %1270, %v340_v18   ;;  %v99_v49 = vunpack.c.l.s8.bf16 %v92_v46  ;;  %v1295_v52 = vld [vmem:[#allocation6 + $0x28] sm:$0xff]   ;;  %v100_v53 = vunpack.c.h.s8.bf16 %v92_v46  ;;  %v1296_v54 = vld [vmem:[%s1626_s2 + $0x18] sm:$0xff]   ;;  %v1297_v55 = vld [vmem:[#allocation6 + $0x30] sm:$0xff]  }
  0x47   :  { %1140 = vmatprep.subr.bf16.mxu0 %v1275_v11  ;;  %397 = vperm.xlu0 %1269, %v339_v19   ;;  %v1298_v56 = vld [vmem:[#allocation6 + $0x38] sm:$0xff]   ;;  %v1299_v57 = vld [vmem:[%s1626_s2 + $0x20] sm:$0xff]   ;;  %v1300_v58 = vld [vmem:[%s1626_s2 + $0x28] sm:$0xff]  }
  0x48   :  { %1169 = vmatpush3.bf16.msra.mxu1 %v1281_v20  ;;  %v1301_v59 = vld [vmem:[%s1626_s2 + $0x30] sm:$0xff]   ;;  %v1302_v60 = vld [vmem:[%s1626_s2 + $0x38] sm:$0xff]  }
  0x49   :  { %1170 = vmatprep.subr.bf16.mxu1 %v1282_v24 }
  0x4a   :  { %1141 = vmatpush3.bf16.msra.mxu0 %v1275_v11  ;;  %372 = vperm.xlu1 %1270, %v334_v22  }
  0x4b   :  { %1142 = vmatprep.subr.bf16.mxu0 %v1276_v12  ;;  %367 = vperm.xlu0 %1269, %v333_v23  }
  0x4c   :  { %1171 = vmatpush3.bf16.msra.mxu1 %v1282_v24 }
  0x4d   :  { %1172 = vmatprep.subr.bf16.mxu1 %v1283_v29 }
  0x4e   :  { %1143 = vmatpush3.bf16.msra.mxu0 %v1276_v12  ;;  %382 = vperm.xlu1 %1270, %v336_v25  }
  0x4f   :  { %1144 = vmatprep.subr.bf16.mxu0 %v1277_v17  ;;  %377 = vperm.xlu0 %1269, %v335_v26  }
  0x50   :  { %1173 = vmatpush3.bf16.msra.mxu1 %v1283_v29 }
  0x51   :  { %1174 = vmatprep.subr.bf16.mxu1 %v1285_v35 }
  0x52   :  { %1145 = vmatpush3.bf16.msra.mxu0 %v1277_v17  ;;  %412 = vperm.xlu1 %1270, %v342_v31  }
  0x53   :  { %1146 = vmatprep.subr.bf16.mxu0 %v1278_v21  ;;  %407 = vperm.xlu0 %1269, %v341_v33  }
  0x54   :  { %1175 = vmatpush3.bf16.msra.mxu1 %v1285_v35 }
  0x55   :  { %1176 = vmatprep.subr.bf16.mxu1 %v1287_v40 }
  0x56   :  { %1147 = vmatpush3.bf16.msra.mxu0 %v1278_v21  ;;  %422 = vperm.xlu1 %1270, %v344_v38  }
  0x57   :  { %1196 = vmatprep.subr.bf16.mxu0 %v1284_v30  ;;  %417 = vperm.xlu0 %1269, %v343_v39  }
  0x58   :  { %1177 = vmatpush3.bf16.msra.mxu1 %v1287_v40 }
  0x59   :  { %1149 = vmatmul.mubr.bf16.vlgmr.msra.gmra.mrb[0].mxu0 %v94_v32  ;;  %1178 = vmatprep.subr.bf16.mxu1 %v1289_v44 }
  0x5a   :  { %1152 = vmatprep.mubr.bf16.mxu0 %v95_v34  ;;  %1197 = vmatpush3.bf16.msra.mxu0 %v1284_v30 }
  0x5b   :  { %1198 = vmatprep.subr.bf16.mxu0 %v1286_v36 }
  0x5c   :  { %1179 = vmatpush3.bf16.msra.mxu1 %v1289_v44 }
  0x5d   :  { %1228 = vmatprep.subr.bf16.mxu1 %v1284_v30 }
  0x5e   :  { %1199 = vmatpush3.bf16.msra.mxu0 %v1286_v36 }
  0x5f   :  { %1200 = vmatprep.subr.bf16.mxu0 %v1288_v41  ;;  %1181 = vmatmul.mubr.bf16.vlgmr.msra.gmra.mrb[0].mxu1 %v1292_v50 }
  0x60   :  { %1236 = vmatpush3.bf16.msra.mxu1 %v1284_v30  ;;  %1184 = vmatprep.mubr.bf16.mxu1 %v1294_v51 }
  0x61   :  { %1153 = vmatmul.mubr.bf16.gmra.mrb[4].mxu0 %v96_v42  ;;  %1229 = vmatprep.subr.bf16.mxu1 %v1286_v36 }
  0x62   :  { %1156 = vmatprep.mubr.bf16.mxu0 %v97_v43  ;;  %1201 = vmatpush3.bf16.msra.mxu0 %v1288_v41 }
  0x63   :  { %1202 = vmatprep.subr.bf16.mxu0 %v1291_v45 }
  0x64   :  { %1237 = vmatpush3.bf16.msra.mxu1 %v1286_v36 }
  0x65   :  { %1230 = vmatprep.subr.bf16.mxu1 %v1288_v41 }
  0x66   :  { %1203 = vmatpush3.bf16.msra.mxu0 %v1291_v45 }
  0x67   :  { %1204 = vmatprep.subr.bf16.mxu0 %v1293_v47  ;;  %1185 = vmatmul.mubr.bf16.gmra.mrb[4].mxu1 %v1296_v54 }
  0x68   :  { %1238 = vmatpush3.bf16.msra.mxu1 %v1288_v41  ;;  %1188 = vmatprep.mubr.bf16.mxu1 %v1299_v57 }
  0x69   :  { %1157 = vmatmul.mubr.bf16.gmra.mrb[8].mxu0 %v98_v48  ;;  %1231 = vmatprep.subr.bf16.mxu1 %v1291_v45 }
  0x6a   :  { %1160 = vmatprep.mubr.bf16.mxu0 %v99_v49  ;;  %1205 = vmatpush3.bf16.msra.mxu0 %v1293_v47 }
  0x6b   :  { %1206 = vmatprep.subr.bf16.mxu0 %v1295_v52 }
  0x6c   :  { %1239 = vmatpush3.bf16.msra.mxu1 %v1291_v45 }
  0x6d   :  { %1232 = vmatprep.subr.bf16.mxu1 %v1293_v47 }
  0x6e   :  { %1207 = vmatpush3.bf16.msra.mxu0 %v1295_v52 }
  0x6f   :  { %1208 = vmatprep.subr.bf16.mxu0 %v1297_v55  ;;  %1189 = vmatmul.mubr.bf16.gmra.mrb[8].mxu1 %v1300_v58 }
  0x70   :  { %1240 = vmatpush3.bf16.msra.mxu1 %v1293_v47  ;;  %1192 = vmatprep.mubr.bf16.mxu1 %v1301_v59 }
  0x71   :  { %1161 = vmatmul.mubr.bf16.gmra.mrb[12].mxu0 %v100_v53  ;;  %1233 = vmatprep.subr.bf16.mxu1 %v1295_v52 }
  0x72   :  { %1209 = vmatpush3.bf16.msra.mxu0 %v1297_v55 }
  0x73   :  { %1210 = vmatprep.subr.bf16.mxu0 %v1298_v56 }
  0x74   :  { %1241 = vmatpush3.bf16.msra.mxu1 %v1295_v52 }
  0x75   :  { %1234 = vmatprep.subr.bf16.mxu1 %v1297_v55 }
  0x76   :  { %1211 = vmatpush3.bf16.msra.mxu0 %v1298_v56 }
  0x77   :  { %1193 = vmatmul.mubr.bf16.gmra.mrb[12].mxu1 %v1302_v60 }
  0x78   :  { %1242 = vmatpush3.bf16.msra.mxu1 %v1297_v55 }
  0x79   :  { %1235 = vmatprep.subr.bf16.mxu1 %v1298_v56 }
  0x7c   :  { %1243 = vmatpush3.bf16.msra.mxu1 %v1298_v56 }
  0xb9   :  { %v358_v61 = vpop.permute.xlu1 %357 }
  0xba   :  { %v348_v62 = vpop.permute.xlu0 %347 }
  0xbd   :  { %v363_v63 = vpop.permute.xlu1 %362 }
  0xbe   :  { %v353_v0 = vpop.permute.xlu0 %352 }
  0xc1   :  { %v393_v1 = vpop.permute.xlu1 %392 }
  0xc2   :  { %v388_v2 = vpop.permute.xlu0 %387 }
  0xc5   :  { %v403_v3 = vpop.permute.xlu1 %402 }
  0xc6   :  { %v398_v4 = vpop.permute.xlu0 %397 }
  0xc9   :  { %v373_v8 = vpop.permute.xlu1 %372 }
  0xca   :  { %v368_v12 = vpop.permute.xlu0 %367 }
  0xcd   :  { %v383_v18 = vpop.permute.xlu1 %382 }
  0xce   :  { %v378_v20 = vpop.permute.xlu0 %377 }
  0xd1   :  { %v413_v29 = vpop.permute.xlu1 %412 }
  0xd2   :  { %v408_v30 = vpop.permute.xlu0 %407 }
  0xd5   :  { %v423_v45 = vpop.permute.xlu1 %422 }
  0xd6   :  { %v418_v46 = vpop.permute.xlu0 %417 }
 0x12c   :  { %v1150_v5 = vpop.f32.mrb[0].mxu0 }
 0x12d   :  { %v215_v6 = vpop.f32.mrb[1].mxu0  ;;  %v427_v9 = vmul.f32 %v1150_v5, %v358_v61 }
 0x12e   :  { %v1151_v7 = vpop.f32.mrb[2].mxu0  ;;  %v425_v13 = vmul.f32 %v348_v62, %v215_v6  ;;  %v1591_v62 = vld [vmem:[%s1630_s6] ss:$0 sm:$0xff]  ;;  %s1405_s6 = smov [#allocation9]  }
 0x12f   :  { %v428_v10 = vmul.f32 %v1151_v7, %v363_v63  ;;  %v218_v11 = vpop.f32.mrb[3].mxu0  ;;  %s959_s30 = sshll.u32 %s1405_s6, 4  ;;  %s960_s30 = int_to_ptr.vmem [resolvable:$true] %s959_s30 }
 0x130   :  { %v426_v14 = vmul.f32 %v353_v0, %v218_v11  ;;  %s1369_s8 = scalar_lea.vmem %s960_s30, 1024  ;;  %p1374_p11 = scmp.lt.s32.totalorder %s960_s30, %s960_s30 }
 0x131   :  { %v442_v15 = vpack.c.bf16 %v428_v10, %v427_v9  ;;  %p1370_p10 = scmp.ne.s32.totalorder %s960_s30, %s1369_s8  ;;  %p1375_p12 = scmp.lt.s32.totalorder %s1369_s8, %s1369_s8 }
 0x132   :  { %v441_v16 = vpack.c.bf16 %v426_v14, %v425_v13  ;;  %v1182_v33 = vpop.f32.mrb[0].mxu1 }
 0x133   :  { %v627_v35 = vpop.f32.mrb[1].mxu1  ;;  %p1376_p13 = por %p1375_p12, %p1374_p11 }
 0x134   :  { %v1154_v17 = vpop.f32.mrb[4].mxu0  ;;  %1212 = vmatprep.mubr.bf16.mxu0 %v441_v16  ;;  %v1183_v39 = vpop.f32.mrb[2].mxu1 }
 0x135   :  { %v231_v19 = vpop.f32.mrb[5].mxu0  ;;  %1213 = vmatmul.mubr.bf16.vlgmr.msra.gmra.mrb[16].mxu0 %v442_v15  ;;  %v431_v22 = vmul.f32 %v1154_v17, %v378_v20  ;;  %v630_v42 = vpop.f32.mrb[3].mxu1  ;;  %p1377_p0 = pnand %p1376_p13, %p1370_p10 }
 0x136   :  { %v1155_v21 = vpop.f32.mrb[6].mxu0  ;;  %v429_v25 = vmul.f32 %v368_v12, %v231_v19 }
 0x137   :  { %v432_v23 = vmul.f32 %v1155_v21, %v383_v18  ;;  %v234_v24 = vpop.f32.mrb[7].mxu0 }
 0x138   :  { %v430_v26 = vmul.f32 %v373_v8, %v234_v24 }
 0x139   :  { %v444_v27 = vpack.c.bf16 %v432_v23, %v431_v22 }
 0x13a   :  { %v443_v28 = vpack.c.bf16 %v430_v26, %v429_v25  ;;  %v1186_v49 = vpop.f32.mrb[4].mxu1 }
 0x13b   :  { %v643_v51 = vpop.f32.mrb[5].mxu1 }
 0x13c   :  { %v1158_v31 = vpop.f32.mrb[8].mxu0  ;;  %1216 = vmatprep.mubr.bf16.mxu0 %v443_v28  ;;  %v1187_v55 = vpop.f32.mrb[6].mxu1 }
 0x13d   :  { %v247_v32 = vpop.f32.mrb[9].mxu0  ;;  %1217 = vmatmul.mubr.bf16.gmra.mrb[20].mxu0 %v444_v27  ;;  %v435_v36 = vmul.f32 %v1158_v31, %v398_v4  ;;  %v646_v58 = vpop.f32.mrb[7].mxu1 }
 0x13e   :  { %v1159_v34 = vpop.f32.mrb[10].mxu0  ;;  %v433_v40 = vmul.f32 %v388_v2, %v247_v32 }
 0x13f   :  { %v436_v37 = vmul.f32 %v1159_v34, %v403_v3  ;;  %v250_v38 = vpop.f32.mrb[11].mxu0 }
 0x140   :  { %v434_v41 = vmul.f32 %v393_v1, %v250_v38 }
 0x141   :  { %v446_v43 = vpack.c.bf16 %v436_v37, %v435_v36 }
 0x142   :  { %v445_v44 = vpack.c.bf16 %v434_v41, %v433_v40 }
 0x144   :  { %v1162_v47 = vpop.f32.mrb[12].mxu0  ;;  %1220 = vmatprep.mubr.bf16.mxu1 %v445_v44 }
 0x145   :  { %v263_v48 = vpop.f32.mrb[13].mxu0  ;;  %1221 = vmatmul.mubr.bf16.vlgmr.msra.gmra.mrb[8].mxu1 %v446_v43  ;;  %v439_v52 = vmul.f32 %v1162_v47, %v418_v46 }
 0x146   :  { %v1163_v50 = vpop.f32.mrb[14].mxu0  ;;  %v437_v56 = vmul.f32 %v408_v30, %v263_v48 }
 0x147   :  { %v440_v53 = vmul.f32 %v1163_v50, %v423_v45  ;;  %v266_v54 = vpop.f32.mrb[15].mxu0 }
 0x148   :  { %v438_v57 = vmul.f32 %v413_v29, %v266_v54 }
 0x149   :  { %v448_v59 = vpack.c.bf16 %v440_v53, %v439_v52 }
 0x14a   :  { %v447_v60 = vpack.c.bf16 %v438_v57, %v437_v56 }
 0x14c   :  { %1224 = vmatprep.mubr.bf16.mxu1 %v447_v60 }
 0x14d   :  { %1225 = vmatmul.mubr.bf16.gmra.mrb[12].mxu1 %v448_v59 }
 0x208   :  { %v1214_v61 = vpop.f32.mrb[16].mxu0 }
 0x209   :  { %v781_v63 = vadd.f32 %v1214_v61, %v1182_v33  ;;  %v772_v0 = vpop.f32.mrb[17].mxu0 }
 0x20a   :  { %v773_v1 = vadd.f32 %v772_v0, %v627_v35  ;;  %v1215_v2 = vpop.f32.mrb[18].mxu0 }
 0x20b   :  { %v844_v3 = vadd.f32 %v1591_v62, %v781_v63  ;;  %v784_v4 = vadd.f32 %v1215_v2, %v1183_v39  ;;  %v775_v5 = vpop.f32.mrb[19].mxu0 }
 0x20c   :  { %v842_v6 = vadd.f32 %v1591_v62, %v773_v1  ;;  %v776_v7 = vadd.f32 %v775_v5, %v630_v42 }
 0x20d   :  { %v845_v8 = vadd.f32 %v1591_v62, %v784_v4  ;;  %v860_v10 = vmax.f32 %v844_v3, 0.0 }
 0x20e   :  { %v843_v9 = vadd.f32 %v1591_v62, %v776_v7  ;;  %v858_v12 = vmax.f32 %v842_v6, 0.0 }
 0x20f   :  { %v861_v11 = vmax.f32 %v845_v8, 0.0 }
 0x210   :  { %v859_v13 = vmax.f32 %v843_v9, 0.0  ;;  %v1218_v14 = vpop.f32.mrb[20].mxu0 }
 0x211   :  { %v1045_v15 = vpack.c.bf16 %v861_v11, %v860_v10  ;;  %v797_v16 = vadd.f32 %v1218_v14, %v1186_v49  ;;  %v788_v17 = vpop.f32.mrb[21].mxu0 }
 0x212   :  { %v1040_v18 = vpack.c.bf16 %v859_v13, %v858_v12  ;;  %v789_v19 = vadd.f32 %v788_v17, %v643_v51  ;;  %v1219_v20 = vpop.f32.mrb[22].mxu0 }
 0x213   :  { %1077 = vst [vmem:[#allocation9 + $0x8] sm:$0xff] %v1045_v15   ;;  %v848_v21 = vadd.f32 %v1591_v62, %v797_v16  ;;  %v800_v22 = vadd.f32 %v1219_v20, %v1187_v55  ;;  %v791_v23 = vpop.f32.mrb[23].mxu0 }
 0x214   :  { %1041 = vst [vmem:[#allocation9] sm:$0xff] %v1040_v18   ;;  %v846_v24 = vadd.f32 %v1591_v62, %v789_v19  ;;  %v792_v25 = vadd.f32 %v791_v23, %v646_v58 }
 0x215   :  { %v849_v26 = vadd.f32 %v1591_v62, %v800_v22  ;;  %v864_v28 = vmax.f32 %v848_v21, 0.0 }
 0x216   :  { %v847_v27 = vadd.f32 %v1591_v62, %v792_v25  ;;  %v862_v30 = vmax.f32 %v846_v24, 0.0 }
 0x217   :  { %v865_v29 = vmax.f32 %v849_v26, 0.0 }
 0x218   :  { %v863_v31 = vmax.f32 %v847_v27, 0.0  ;;  %v1222_v32 = vpop.f32.mrb[8].mxu1 }
 0x219   :  { %v1055_v33 = vpack.c.bf16 %v865_v29, %v864_v28  ;;  %v852_v34 = vadd.f32 %v1222_v32, %v1591_v62  ;;  %v804_v35 = vpop.f32.mrb[9].mxu1 }
 0x21a   :  { %v1050_v36 = vpack.c.bf16 %v863_v31, %v862_v30  ;;  %v850_v37 = vadd.f32 %v1591_v62, %v804_v35  ;;  %v1223_v38 = vpop.f32.mrb[10].mxu1 }
 0x21b   :  { %1079 = vst [vmem:[#allocation9 + $0x18] sm:$0xff] %v1055_v33   ;;  %v853_v39 = vadd.f32 %v1223_v38, %v1591_v62  ;;  %v807_v40 = vpop.f32.mrb[11].mxu1  ;;  %v868_v42 = vmax.f32 %v852_v34, 0.0 }
 0x21c   :  { %1078 = vst [vmem:[#allocation9 + $0x10] sm:$0xff] %v1050_v36   ;;  %v851_v41 = vadd.f32 %v1591_v62, %v807_v40  ;;  %v866_v44 = vmax.f32 %v850_v37, 0.0 }
 0x21d   :  { %v869_v43 = vmax.f32 %v853_v39, 0.0 }
 0x21e   :  { %v867_v45 = vmax.f32 %v851_v41, 0.0 }
 0x21f   :  { %v1065_v46 = vpack.c.bf16 %v869_v43, %v868_v42 }
 0x220   :  { %v1060_v47 = vpack.c.bf16 %v867_v45, %v866_v44  ;;  %v1226_v48 = vpop.f32.mrb[12].mxu1 }
 0x221   :  { %1081 = vst [vmem:[#allocation9 + $0x28] sm:$0xff] %v1065_v46   ;;  %v856_v49 = vadd.f32 %v1226_v48, %v1591_v62  ;;  %v820_v50 = vpop.f32.mrb[13].mxu1 }
 0x222   :  { %1080 = vst [vmem:[#allocation9 + $0x20] sm:$0xff] %v1060_v47   ;;  %v854_v51 = vadd.f32 %v1591_v62, %v820_v50  ;;  %v1227_v52 = vpop.f32.mrb[14].mxu1 }
 0x223   :  { %v857_v53 = vadd.f32 %v1227_v52, %v1591_v62  ;;  %v823_v54 = vpop.f32.mrb[15].mxu1  ;;  %v872_v56 = vmax.f32 %v856_v49, 0.0 }
 0x224   :  { %v855_v55 = vadd.f32 %v1591_v62, %v823_v54  ;;  %v870_v58 = vmax.f32 %v854_v51, 0.0 }
 0x225   :  { %v873_v57 = vmax.f32 %v857_v53, 0.0 }
 0x226   :  { %v871_v59 = vmax.f32 %v855_v55, 0.0 }
 0x227   :  { %v1075_v60 = vpack.c.bf16 %v873_v57, %v872_v56 }
 0x228   :  { %v1070_v61 = vpack.c.bf16 %v871_v59, %v870_v58 }
 0x229   :  { %1083 = vst [vmem:[#allocation9 + $0x38] sm:$0xff] %v1075_v60  }
 0x22a   :  { %1082 = vst [vmem:[#allocation9 + $0x30] sm:$0xff] %v1070_v61  }
 0x22b   :  { %1380 = shalt.err (!%p1377_p0)
}
 0x22c   :  { %s1381_s13 = scalar_lea.hbm %s1631_s7, 1024 }
 0x22d   :  { %p1382_p1 = scmp.ne.s32.totalorder %s1631_s7, %s1381_s13  ;;  %p1385_p2 = scmp.lt.u32.totalorder %s1381_s13, %s1631_s7 }
 0x22f   :  { %p1387_p3 = pnand %p1385_p2, %p1382_p1 }
 0x231   :  { %1390 = shalt.err (!%p1387_p3)
}
 0x232   :  { %965 = dma.vmem_to_hbm [thread:$0]  %s960_s30, 1024, %s1631_s7, [#allocation5], %s1398_s11, %s1398_s11, %s1399_s12  }
 0x233   :  { %1395 = dma.done.wait [#allocation5], 1024  }
 0x234   :  { %1396 = vsyncadd [#allocation5], 4294966272 }
 0x235   :  { %969 = vsyncpa [#allocation4], 1 }
 0x236   :  { %970 = vsyncpa [#allocation7], 1 }
 0x237   :  { %971 = vsyncpa [#allocation5], 1 }

</bundles_post_ra>
